<compile_context>
chip_gen: v7x
topology: tpu7x:2x2x1
jax: 0.10.0
libtpu: 0.0.40
codegen_flags: <defaults>
</compile_context>

<pallas_src>
import functools

import jax
import jax.numpy as jnp
from jax import lax
from jax.experimental import pallas as pl
from jax.experimental.pallas import tpu as pltpu

LANES = 128


def _round_up(x, m):
    return (x + m - 1) // m * m


def _pad2d(a, rows, cols):
    return jnp.pad(a, ((0, rows - a.shape[0]), (0, cols - a.shape[1])))


# --------------------------- MLP kernel -------------------------------------
def _mlp_kernel(x_ref, w1_ref, b1_ref, w2_ref, b2_ref, z0_ref):
    h = jnp.dot(x_ref[...], w1_ref[...], preferred_element_type=jnp.float32)
    h = jnp.maximum(h + b1_ref[...], 0.0)
    z0_ref[...] = (jnp.dot(h, w2_ref[...], preferred_element_type=jnp.float32)
                   + b2_ref[...])


# ------------------------ APPNP propagation kernel --------------------------
def _prop_kernel(z0_ref, a_ref, o_ref, acc_ref, zbuf_ref, *,
                 K, alpha, ti, tj, num_classes):
    k = pl.program_id(0)
    i = pl.program_id(1)
    j = pl.program_id(2)
    num_j = pl.num_programs(2)

    row_i = pl.multiple_of(i * ti, ti)
    row_j = pl.multiple_of(j * tj, tj)

    # Stage z0 into ping-pong slot 1 (the read slot for k == 0), once per tile.
    @pl.when((k == 0) & (i == 0))
    def _():
        zbuf_ref[1, pl.ds(row_j, tj), :] = z0_ref[pl.ds(row_j, tj), :]

    # Start each row-tile accumulation with the teleport term alpha * z0.
    @pl.when(j == 0)
    def _():
        acc_ref[...] = alpha * z0_ref[pl.ds(row_i, ti), :]

    read_slot = (k + 1) % 2
    write_slot = k % 2

    # (1 - alpha) is folded into a_ref (bf16); accumulate in f32 on the MXU.
    z_old = zbuf_ref[read_slot, pl.ds(row_j, tj), :].astype(jnp.bfloat16)
    acc_ref[...] += jnp.dot(a_ref[...], z_old,
                            preferred_element_type=jnp.float32)

    is_last_j = j == num_j - 1

    @pl.when(is_last_j)
    def _():
        zbuf_ref[write_slot, pl.ds(row_i, ti), :] = acc_ref[...]

    @pl.when(is_last_j & (k == K - 1))
    def _():
        z = acc_ref[...]
        # lane-dense log_softmax over the first num_classes lanes only
        col = lax.broadcasted_iota(jnp.int32, z.shape, 1)
        zm = jnp.where(col < num_classes, z, -jnp.inf)
        m = jnp.max(zm, axis=1, keepdims=True)
        e = jnp.exp(zm - m)                      # pad lanes -> exp(-inf) = 0
        lse = jnp.log(jnp.sum(e, axis=1, keepdims=True)) + m
        o_ref[pl.ds(row_i, ti), :] = z - lse


# ------------------------------ wrapper --------------------------------------
def my_appnp_forward(x, edge_index, w1, b1, w2, b2, *, K, alpha, tile=256):
    """x: [N, F_in] f32, edge_index: [2, E] int32, weights stored [in, out]."""
    assert K >= 1
    n, f_in = x.shape
    hid = w1.shape[1]
    num_classes = w2.shape[1]

    # --- glue: dense GCN-normalized adjacency (PyG gcn_norm semantics) ------
    src, dst = edge_index[0], edge_index[1]
    adj = jnp.zeros((n, n), jnp.float32).at[dst, src].add(1.0)   # duplicates sum
    diag = jnp.diagonal(adj)
    adj = adj + jnp.diag(jnp.where(diag > 0.0, 0.0, 1.0))        # add missing self-loops
    deg = jnp.sum(adj, axis=1)
    dis = jnp.where(deg > 0.0, lax.rsqrt(deg), 0.0)
    a_scaled = (1.0 - alpha) * (adj * dis[:, None] * dis[None, :])

    # --- padding: lane-dense classes, aligned tiles --------------------------
    n_pad = _round_up(n, tile)
    f_pad = _round_up(f_in, LANES)
    h_pad = _round_up(hid, LANES)
    c_pad = _round_up(num_classes, LANES)

    x_p = _pad2d(x, n_pad, f_pad)
    w1_p = _pad2d(w1, f_pad, h_pad)
    b1_p = _pad2d(b1.reshape(1, -1), 1, h_pad)
    w2_p = _pad2d(w2, h_pad, c_pad)
    b2_p = _pad2d(b2.reshape(1, -1), 1, c_pad)
    a_p = _pad2d(a_scaled, n_pad, n_pad).astype(jnp.bfloat16)

    # --- kernel 1: MLP (row-tiled, weights resident) --------------------------
    tm = tile
    z0 = pl.pallas_call(
        _mlp_kernel,
        out_shape=jax.ShapeDtypeStruct((n_pad, c_pad), jnp.float32),
        grid=(n_pad // tm,),
        in_specs=[
            pl.BlockSpec((tm, f_pad), lambda m: (m, 0)),
            pl.BlockSpec((f_pad, h_pad), lambda m: (0, 0)),
            pl.BlockSpec((1, h_pad), lambda m: (0, 0)),
            pl.BlockSpec((h_pad, c_pad), lambda m: (0, 0)),
            pl.BlockSpec((1, c_pad), lambda m: (0, 0)),
        ],
        out_specs=pl.BlockSpec((tm, c_pad), lambda m: (m, 0)),
        compiler_params=pltpu.CompilerParams(
            dimension_semantics=("parallel",),
            vmem_limit_bytes=64 * 1024 * 1024),
    )(x_p, w1_p, b1_p, w2_p, b2_p)

    # --- kernel 2: K propagation steps + log_softmax --------------------------
    ti = tj = tile
    num_i = n_pad // ti
    num_j = n_pad // tj
    kernel = functools.partial(_prop_kernel, K=K, alpha=alpha, ti=ti, tj=tj,
                               num_classes=num_classes)
    cost = pl.CostEstimate(
        flops=2 * K * n_pad * n_pad * c_pad,
        transcendentals=n_pad * c_pad,
        bytes_accessed=K * n_pad * n_pad * 2 + 3 * n_pad * c_pad * 4,
    )
    out = pl.pallas_call(
        kernel,
        out_shape=jax.ShapeDtypeStruct((n_pad, c_pad), jnp.float32),
        grid=(K, num_i, num_j),
        in_specs=[
            pl.BlockSpec((n_pad, c_pad), lambda k, i, j: (0, 0)),  # z0 resident
            pl.BlockSpec((ti, tj), lambda k, i, j: (i, j)),        # A_hat stream
        ],
        out_specs=pl.BlockSpec((n_pad, c_pad), lambda k, i, j: (0, 0)),
        scratch_shapes=[
            pltpu.VMEM((ti, c_pad), jnp.float32),        # per-row-tile accumulator
            pltpu.VMEM((2, n_pad, c_pad), jnp.float32),  # z ping-pong buffer
        ],
        compiler_params=pltpu.CompilerParams(
            # k carries state, j is a reduction, and the shared z buffer makes
            # the row axis unsafe to split across cores -> all "arbitrary".
            dimension_semantics=("arbitrary", "arbitrary", "arbitrary"),
            vmem_limit_bytes=64 * 1024 * 1024),
        cost_estimate=cost,
    )(z0, a_p)

    return out[:n, :num_classes]


if __name__ == "__main__":
    N, F_IN, HID, NUM_CLS = 512, 48, 64, 10
    K, ALPHA = 4, 0.1

    key = jax.random.PRNGKey(0)
    kx, kw1, kb1, kw2, kb2, ke = jax.random.split(key, 6)

    x = jax.random.normal(kx, (N, F_IN), jnp.float32)

    lim1 = 1.0 / (F_IN ** 0.5)
    w1 = jax.random.uniform(kw1, (F_IN, HID), jnp.float32, -lim1, lim1)
    b1 = jax.random.uniform(kb1, (HID,), jnp.float32, -lim1, lim1)
    lim2 = 1.0 / (HID ** 0.5)
    w2 = jax.random.uniform(kw2, (HID, NUM_CLS), jnp.float32, -lim2, lim2)
    b2 = jax.random.uniform(kb2, (NUM_CLS,), jnp.float32, -lim2, lim2)

    # Deterministic undirected-ish graph: ring (both directions) + random extras.
    src_ring = jnp.arange(N, dtype=jnp.int32)
    dst_ring = (src_ring + 1) % N
    extra_src = jax.random.randint(ke, (4 * N,), 0, N, jnp.int32)
    extra_dst = jnp.roll(extra_src, 13)
    src = jnp.concatenate([src_ring, dst_ring, extra_src, extra_dst])
    dst = jnp.concatenate([dst_ring, src_ring, extra_dst, extra_src])
    edge_index = jnp.stack([src, dst], axis=0)

    out = my_appnp_forward(x, edge_index, w1, b1, w2, b2, K=K, alpha=ALPHA)
    out = jax.block_until_ready(out)

    # --- pure-JAX reference (f32 adjacency) for a tolerance check -------------
    def ref_forward():
        adj = jnp.zeros((N, N), jnp.float32).at[edge_index[1],
                                                edge_index[0]].add(1.0)
        diag = jnp.diagonal(adj)
        adj = adj + jnp.diag(jnp.where(diag > 0.0, 0.0, 1.0))
        deg = jnp.sum(adj, axis=1)
        dis = jnp.where(deg > 0.0, lax.rsqrt(deg), 0.0)
        a_hat = adj * dis[:, None] * dis[None, :]
        h = jnp.maximum(x @ w1 + b1, 0.0)
        z = h @ w2 + b2
        h0 = z
        for _ in range(K):
            z = (1.0 - ALPHA) * (a_hat @ z) + ALPHA * h0
        return jax.nn.log_softmax(z, axis=1)

    ref = ref_forward()
    assert out.shape == (N, NUM_CLS)
    # log_softmax rows must sum (in prob space) to ~1
    assert jnp.allclose(jnp.sum(jnp.exp(out), axis=1), 1.0, atol=1e-3)
    # bf16 A_hat introduces small drift vs the f32 reference
    assert jnp.max(jnp.abs(out - ref)) < 0.1
    print("KERNEL_OK")
</pallas_src>

<mosaic_0001>
module attributes {stable_mosaic.version = 11 : i64} {
  func.func @_mlp_kernel(%arg0: i32, %arg1: memref<256x128xf32, #tpu.memory_space<vmem>>, %arg2: memref<128x128xf32, #tpu.memory_space<vmem>>, %arg3: memref<1x128xf32, #tpu.memory_space<vmem>>, %arg4: memref<128x128xf32, #tpu.memory_space<vmem>>, %arg5: memref<1x128xf32, #tpu.memory_space<vmem>>, %arg6: memref<256x128xf32, #tpu.memory_space<vmem>>) attributes {dimension_semantics = [#tpu.dimension_semantics<parallel>], iteration_bounds = array<i64: 2>, scalar_prefetch = 0 : i64, scratch_operands = 0 : i64, tpu.core_type = #tpu.core_type<tc>, window_params = [{transform_indices = @transform_0, window_bounds = array<i64: 256, 128>}, {pipeline_mode = #tpu.pipeline_mode<synchronous>, transform_indices = @transform_1, window_bounds = array<i64: 128, 128>}, {pipeline_mode = #tpu.pipeline_mode<synchronous>, transform_indices = @transform_2, window_bounds = array<i64: 1, 128>}, {pipeline_mode = #tpu.pipeline_mode<synchronous>, transform_indices = @transform_3, window_bounds = array<i64: 128, 128>}, {pipeline_mode = #tpu.pipeline_mode<synchronous>, transform_indices = @transform_4, window_bounds = array<i64: 1, 128>}, {transform_indices = @transform_5, window_bounds = array<i64: 256, 128>}]} {
    %c0 = arith.constant 0 : index
    %c0_0 = arith.constant 0 : index
    %0 = vector.load %arg1[%c0, %c0_0] : memref<256x128xf32, #tpu.memory_space<vmem>>, vector<256x128xf32>
    %c0_1 = arith.constant 0 : index
    %c0_2 = arith.constant 0 : index
    %1 = vector.load %arg2[%c0_1, %c0_2] : memref<128x128xf32, #tpu.memory_space<vmem>>, vector<128x128xf32>
    %cst = arith.constant dense<0.000000e+00> : vector<256x128xf32>
    %2 = tpu.matmul %0, %1, %cst {dimension_numbers = #tpu.dot_dimension_numbers<[1], [0], [0], [1], [0, 0, 1, 1], [], []>} : vector<256x128xf32>, vector<128x128xf32>, vector<256x128xf32> -> vector<256x128xf32>
    %c0_3 = arith.constant 0 : index
    %c0_4 = arith.constant 0 : index
    %3 = vector.load %arg3[%c0_3, %c0_4] : memref<1x128xf32, #tpu.memory_space<vmem>>, vector<1x128xf32>
    %4 = vector.broadcast %3 : vector<1x128xf32> to vector<256x128xf32>
    %5 = arith.addf %2, %4 : vector<256x128xf32>
    %cst_5 = arith.constant 0.000000e+00 : f32
    %6 = vector.broadcast %cst_5 : f32 to vector<256x128xf32>
    %7 = arith.maximumf %5, %6 : vector<256x128xf32>
    %c0_6 = arith.constant 0 : index
    %c0_7 = arith.constant 0 : index
    %8 = vector.load %arg4[%c0_6, %c0_7] : memref<128x128xf32, #tpu.memory_space<vmem>>, vector<128x128xf32>
    %cst_8 = arith.constant dense<0.000000e+00> : vector<256x128xf32>
    %9 = tpu.matmul %7, %8, %cst_8 {dimension_numbers = #tpu.dot_dimension_numbers<[1], [0], [0], [1], [0, 0, 1, 1], [], []>} : vector<256x128xf32>, vector<128x128xf32>, vector<256x128xf32> -> vector<256x128xf32>
    %c0_9 = arith.constant 0 : index
    %c0_10 = arith.constant 0 : index
    %10 = vector.load %arg5[%c0_9, %c0_10] : memref<1x128xf32, #tpu.memory_space<vmem>>, vector<1x128xf32>
    %11 = vector.broadcast %10 : vector<1x128xf32> to vector<256x128xf32>
    %12 = arith.addf %9, %11 : vector<256x128xf32>
    %c0_11 = arith.constant 0 : index
    %c0_12 = arith.constant 0 : index
    %13 = vector.load %arg6[%c0_11, %c0_12] : memref<256x128xf32, #tpu.memory_space<vmem>>, vector<256x128xf32>
    tpu.vector_store %arg6[%c0_11, %c0_12], %12 {strides = array<i32>} : memref<256x128xf32, #tpu.memory_space<vmem>>, vector<256x128xf32>,
    return
  }
  func.func @transform_0(%arg0: i32) -> (i32, i32) {
    %c0_i32 = arith.constant 0 : i32
    %c0_i32_0 = arith.constant 0 : i32
    return %arg0, %c0_i32 : i32, i32
  }
  func.func @transform_1(%arg0: i32) -> (i32, i32) {
    %c0_i32 = arith.constant 0 : i32
    %c0_i32_0 = arith.constant 0 : i32
    %c0_i32_1 = arith.constant 0 : i32
    return %c0_i32, %c0_i32_0 : i32, i32
  }
  func.func @transform_2(%arg0: i32) -> (i32, i32) {
    %c0_i32 = arith.constant 0 : i32
    %c0_i32_0 = arith.constant 0 : i32
    %c0_i32_1 = arith.constant 0 : i32
    return %c0_i32, %c0_i32_0 : i32, i32
  }
  func.func @transform_3(%arg0: i32) -> (i32, i32) {
    %c0_i32 = arith.constant 0 : i32
    %c0_i32_0 = arith.constant 0 : i32
    %c0_i32_1 = arith.constant 0 : i32
    return %c0_i32, %c0_i32_0 : i32, i32
  }
  func.func @transform_4(%arg0: i32) -> (i32, i32) {
    %c0_i32 = arith.constant 0 : i32
    %c0_i32_0 = arith.constant 0 : i32
    %c0_i32_1 = arith.constant 0 : i32
    return %c0_i32, %c0_i32_0 : i32, i32
  }
  func.func @transform_5(%arg0: i32) -> (i32, i32) {
    %c0_i32 = arith.constant 0 : i32
    %c0_i32_0 = arith.constant 0 : i32
    return %arg0, %c0_i32 : i32, i32
  }
}

</mosaic_0001>

<bundles_post_ra>
// kernel: tpu_custom_call.1
= control target key start
LH: loop header
LB: loop body
LE: loop exit
PB: predicated region body
PF: predicated region fallthrough
CT: control target
= control target key end

     0   :  { %10 = vsyncpa [#allocation3], 0  ;;  %s2138_s0 = inlined_call_operand.hbm [shape: f32[512,128], index: 0, kind: input, shape index: {}]   ;;  %s2139_s1 = inlined_call_operand.hbm [shape: f32[128,128], index: 1, kind: input, shape index: {}]   ;;  %s2140_s2 = inlined_call_operand.hbm [shape: f32[1,128], index: 2, kind: input, shape index: {}]   ;;  %s2141_s3 = inlined_call_operand.hbm [shape: f32[128,128], index: 3, kind: input, shape index: {}]   ;;  %s2142_s4 = inlined_call_operand.hbm [shape: f32[1,128], index: 4, kind: input, shape index: {}]   ;;  %s2143_s5 = inlined_call_operand.hbm [shape: f32[512,128], index: 5, kind: output, shape index: {}]  }
   0x1   :  { %12 = vsyncpa [#allocation3 + $0x1], 0 }
   0x2   :  { %13 = vsyncpa [#allocation6], 0 }
   0x3   :  { %14 = vsyncpa [#allocation9], 0 }
   0x4   :  { %15 = vsyncpa [#allocation4], 0 }
   0x5   :  { %17 = vsyncpa [#allocation4 + $0x1], 0  ;;  %s1711_s18 = smov 0   ;;  %s1713_s19 = smov 0  }
   0x6   :  { %s1715_s20 = smov 0   ;;  %s1717_s21 = smov 0  }
   0x7 LB: > { %s1732_s22 = sadd.s32 4294967295, %s1669_s21   ;;  %s1016_s23 = sadd.s32 4294967294, %s1669_s21   ;;  %s1669_s21 = sphi %s1717_s21, %s2166_s21   ;;  %s1665_s20 = sphi %s1715_s20, %s2165_s20   ;;  %s1661_s19 = sphi %s1713_s19, %s2164_s19   ;;  %s1657_s18 = sphi %s1711_s18, %s2163_s18  }
   0x8   : > { %p43_p0 = scmp.ne.s32.totalorder %s1661_s19, %s1657_s18  ;;  %p2144_p1 = scmp.eq.s32.totalorder %s1732_s22, 0 }
   0x9   : > { %p157_p3 = scmp.eq.s32.totalorder %s1016_s23, 1  ;;  %p1017_p5 = scmp.ge.s32.totalorder %s1669_s21, 1 }
   0xa   : > { %p1741_p4 = por %p2144_p1, %p43_p0  ;;  %p164_p7 = scmp.lt.s32.totalorder %s1669_s21, 3 }
   0xb   : > { %p1746_p6 = por %p157_p3, %p43_p0  ;;  %s1671_s27 = smov [#allocation5]  }
   0xc   : > { %s2147_s24 = scalar_select %p1741_p4, 1, 0 }
   0xd   : > { %s2148_s25 = scalar_select %p1746_p6, 1, 0 }
   0xe   : > { %p1751_p8 = pnand %p1017_p5, %p164_p7  ;;  %s176_s28 = sshll.u32 %s1671_s27, 4  ;;  %s1755_s28 = int_to_ptr.vmem [resolvable:$true] %s176_s28 }
   0xf   : > { %s1672_s30 = smov [#allocation8]   ;;  %s1673_s7 = smov [#allocation7]  }
  0x10   : > { %s2149_s26 = scalar_select %p1751_p8, 1, 0 }
  0x11   : > { %p1382_p9 = pneg %p1751_p8  ;;  %s200_s6 = sshll.u32 %s1672_s30, 4  ;;  %s1766_s6 = int_to_ptr.vmem [resolvable:$true] %s200_s6 }
  0x12   : > { %s1768_s8 = sshll.u32 %s1673_s7, 4  ;;  %s1453_s11 = scalar_lea.hbm %s2139_s1, 2048  ;;  %s191_s8 = int_to_ptr.vmem [resolvable:$true] %s1768_s8 }
  0x13   : > { %p1762_p11 = pnand %p1382_p9, %p2144_p1  ;;  %p1454_p12 = scmp.ne.s32.totalorder %s2139_s1, %s1453_s11 }
  0x14   : > { %p1460_p5 = scmp.lt.u32.totalorder %s1453_s11, %s2139_s1 }
  0x15   : > { %p1778_p13 = pneg %p1762_p11 }
  0x17   : > { %p1456_p0 = pnand %p1778_p13, %p1454_p12 }
  0x19   : > { %p1457_p3 = pneg %p1456_p0 }
  0x1b   : > { %p1462_p7 = pnand %p1460_p5, %p1457_p3 }
  0x1d   : > { %1465 = shalt.err (!%p1462_p7)
}
  0x1e   : > { %s1466_s17 = scalar_lea.vmem %s1755_s28, 2048  ;;  %p1474_p2 = scmp.lt.s32.totalorder %s1755_s28, %s1755_s28 }
  0x1f   : > { %p1467_p9 = scmp.ne.s32.totalorder %s1755_s28, %s1466_s17  ;;  %p1475_p6 = scmp.lt.s32.totalorder %s1466_s17, %s1466_s17 }
  0x21   : > { %p1469_p10 = pnand %p1467_p9, %p1778_p13  ;;  %p1476_p12 = por %p1475_p6, %p1474_p2 }
  0x23   : > { %p1470_p1 = pneg %p1469_p10 }
  0x25   : > { %p1477_p0 = pnand %p1476_p12, %p1470_p1 }
  0x27   : > { %1480 = shalt.err (!%p1477_p0)
}
  0x28   : > { %s1674_s23 = smov 128   ;;  %s1675_s27 = smov 8  }
  0x29   : > { %1385 = dma.hbm_to_vmem [thread:$0]  (!%p1762_p11), %s2139_s1, 2048, %s1755_s28, [#allocation6], %s1674_s23, %s1674_s23, %s1675_s27  }
  0x2a   : > { %s1481_s11 = scalar_lea.hbm %s2141_s3, 2048 }
  0x2b   : > { %p1482_p1 = scmp.ne.s32.totalorder %s2141_s3, %s1481_s11  ;;  %p1488_p10 = scmp.lt.u32.totalorder %s1481_s11, %s2141_s3 }
  0x2d   : > { %p1484_p2 = pnand %p1482_p1, %p1778_p13 }
  0x2f   : > { %p1485_p6 = pneg %p1484_p2 }
  0x31   : > { %p1490_p3 = pnand %p1488_p10, %p1485_p6 }
  0x33   : > { %1493 = shalt.err (!%p1490_p3)
}
  0x34   : > { %s1494_s28 = scalar_lea.vmem %s1766_s6, 2048  ;;  %p1502_p12 = scmp.lt.s32.totalorder %s1766_s6, %s1766_s6 }
  0x35   : > { %p1495_p5 = scmp.ne.s32.totalorder %s1766_s6, %s1494_s28  ;;  %p1503_p0 = scmp.lt.s32.totalorder %s1494_s28, %s1494_s28 }
  0x37   : > { %p1497_p7 = pnand %p1495_p5, %p1778_p13  ;;  %p1504_p1 = por %p1503_p0, %p1502_p12 }
  0x39   : > { %p1498_p9 = pneg %p1497_p7 }
  0x3b   : > { %p1505_p2 = pnand %p1504_p1, %p1498_p9 }
  0x3d   : > { %1508 = shalt.err (!%p1505_p2)
}
  0x3e   : > { %1391 = dma.hbm_to_vmem [thread:$0]  (!%p1762_p11), %s2141_s3, 2048, %s1766_s6, [#allocation9], %s1674_s23, %s1674_s23, %s1675_s27  }
  0x3f   : > { %s1509_s10 = scalar_lea.hbm %s2140_s2, 16 }
  0x40   : > { %p1510_p6 = scmp.ne.s32.totalorder %s2140_s2, %s1509_s10  ;;  %p1516_p5 = scmp.lt.u32.totalorder %s1509_s10, %s2140_s2 }
  0x42   : > { %p1512_p10 = pnand %p1510_p6, %p1778_p13 }
  0x44   : > { %p1513_p3 = pneg %p1512_p10 }
  0x46   : > { %p1518_p7 = pnand %p1516_p5, %p1513_p3 }
  0x48   : > { %1521 = shalt.err (!%p1518_p7)
}
  0x49   : > { %s1522_s16 = scalar_lea.vmem %s191_s8, 16  ;;  %s1529_s6 = scalar_lea.vmem %s191_s8, 32 }
  0x4a   : > { %p1523_p9 = scmp.ne.s32.totalorder %s191_s8, %s1522_s16  ;;  %p1530_p1 = scmp.lt.s32.totalorder %s191_s8, %s191_s8 }
  0x4b   : > { %p1531_p2 = scmp.lt.s32.totalorder %s1529_s6, %s1522_s16 }
  0x4c   : > { %p1525_p12 = pnand %p1523_p9, %p1778_p13 }
  0x4d   : > { %p1532_p4 = por %p1531_p2, %p1530_p1 }
  0x4e   : > { %p1526_p0 = pneg %p1525_p12 }
  0x50   : > { %p1533_p8 = pnand %p1532_p4, %p1526_p0 }
  0x52   : > { %1536 = shalt.err (!%p1533_p8)
}
  0x53   : > { %1388 = dma.hbm_to_vmem [thread:$0]  (!%p1762_p11), %s2140_s2, 16, %s191_s8, [#allocation6]  }
  0x54   : > { %s1676_s30 = smov [#allocation10]   ;;  %s1537_s11 = scalar_lea.hbm %s2142_s4, 16 }
  0x55   : > { %s214_s7 = sshll.u32 %s1676_s30, 4  ;;  %p1538_p6 = scmp.ne.s32.totalorder %s2142_s4, %s1537_s11  ;;  %s215_s7 = int_to_ptr.vmem [resolvable:$true] %s214_s7 }
  0x56   : > { %p1544_p10 = scmp.lt.u32.totalorder %s1537_s11, %s2142_s4 }
  0x57   : > { %p1540_p4 = pnand %p1538_p6, %p1778_p13 }
  0x59   : > { %p1541_p8 = pneg %p1540_p4 }
  0x5b   : > { %p1546_p3 = pnand %p1544_p10, %p1541_p8 }
  0x5d   : > { %1549 = shalt.err (!%p1546_p3)
}
  0x5e   : > { %s1550_s8 = scalar_lea.vmem %s215_s7, 16  ;;  %s1557_s6 = scalar_lea.vmem %s215_s7, 32 }
  0x5f   : > { %p1551_p5 = scmp.ne.s32.totalorder %s215_s7, %s1550_s8  ;;  %p1558_p12 = scmp.lt.s32.totalorder %s215_s7, %s215_s7 }
  0x60   : > { %p1559_p0 = scmp.lt.s32.totalorder %s1557_s6, %s1550_s8 }
  0x61   : > { %p1553_p7 = pnand %p1551_p5, %p1778_p13 }
  0x62   : > { %p1560_p1 = por %p1559_p0, %p1558_p12 }
  0x63   : > { %p1554_p9 = pneg %p1553_p7 }
  0x65   : > { %p1561_p2 = pnand %p1560_p1, %p1554_p9 }
  0x67   : > { %1564 = shalt.err (!%p1561_p2)
}
  0x68   : > { %1394 = dma.hbm_to_vmem [thread:$0]  (!%p1762_p11), %s2142_s4, 16, %s215_s7, [#allocation9]  }
  0x69   : > { %s1866_s14 = sadd.s32 1, %s1669_s21   ;;  %s30_s30 = sadd.s32 1, %s1665_s20 }
  0x6a   : > { %s27_s29 = ssub.s32 %s1669_s21, %s1866_s14  ;;  %p37_p13 = scmp.ne.s32.totalorder %s1665_s20, %s1661_s19 }
  0x6b   : > { %p28_p6 = scmp.eq.s32.totalorder %s27_s29, 0  ;;  %p38_p4 = scmp.eq.s32.totalorder %s1669_s21, 0 }
  0x6c   : > { %p2152_p8 = scmp.eq.s32.totalorder %s1732_s22, 1  ;;  %p1407_p3 = scmp.lt.s32.totalorder %s1669_s21, 2 }
  0x6d   : > { %s1882_s10 = scalar_select %p28_p6, %s1665_s20, %s30_s30  }
  0x6e   : > { %p1876_p10 = por %p2152_p8, %p37_p13  ;;  %p39_p5 = por %p38_p4, %p37_p13 }
  0x6f   : > { %s225_s11 = sand.u32 1, %s1665_s20   ;;  %s1040_s7 = sshll.u32 %s1669_s21, 12 }
  0x70   : > { %s1023_s12 = sshll.u32 %s225_s11, 8  ;;  %s1889_s16 = scalar_lea.hbm %s2138_s0, %s1040_s7 }
  0x71   : > { %s229_s8 = scalar_lea.vmem [#allocation2], %s1023_s12  ;;  %p1893_p11 = pnand %p1407_p3, %p39_p5 }
  0x72   : > { %s236_s6 = sshll.u32 %s229_s8, 4  ;;  %s1897_s17 = scalar_lea.sflag [#allocation3], %s225_s11  ;;  %s1891_s6 = int_to_ptr.vmem [resolvable:$true] %s236_s6 }
  0x73   : > { %s1565_s30 = scalar_lea.hbm %s1889_s16, 4096  ;;  %p1567_p9 = pneg %p1893_p11 }
  0x74   : > { %p1566_p7 = scmp.ne.s32.totalorder %s1889_s16, %s1565_s30  ;;  %s1570_s7 = scalar_lea.hbm %s2138_s0, 8192 }
  0x75   : > { %p1571_p1 = scmp.lt.u32.totalorder %s1889_s16, %s2138_s0  ;;  %p1572_p2 = scmp.lt.u32.totalorder %s1570_s7, %s1565_s30 }
  0x76   : > { %p1568_p12 = pnand %p1567_p9, %p1566_p7  ;;  %p1574_p6 = scmp.lt.u32.totalorder %s1565_s30, %s1889_s16 }
  0x77   : > { %p1573_p13 = por %p1572_p2, %p1571_p1 }
  0x78   : > { %p1569_p0 = pneg %p1568_p12 }
  0x79   : > { %p1575_p4 = por %p1574_p6, %p1573_p13 }
  0x7b   : > { %p1576_p8 = pnand %p1575_p4, %p1569_p0 }
  0x7d   : > { %1579 = shalt.err (!%p1576_p8)
}
  0x7e   : > { %s1580_s11 = scalar_lea.vmem %s1891_s6, 4096  ;;  %s1677_s8 = smov [#allocation2]  }
  0x7f   : > { %p1581_p3 = scmp.ne.s32.totalorder %s1891_s6, %s1580_s11  ;;  %s1585_s29 = sshll.u32 %s1677_s8, 4  ;;  %s1586_s29 = int_to_ptr.vmem [resolvable:$false] %s1585_s29 }
  0x80   : > { %s1587_s12 = scalar_lea.vmem %s1586_s29, 8192  ;;  %p1588_p12 = scmp.lt.s32.totalorder %s1891_s6, %s1586_s29 }
  0x81   : > { %p1583_p5 = pnand %p1581_p3, %p1567_p9  ;;  %p1589_p1 = scmp.lt.s32.totalorder %s1587_s12, %s1580_s11 }
  0x83   : > { %p1584_p7 = pneg %p1583_p5  ;;  %p1590_p2 = por %p1589_p1, %p1588_p12 }
  0x85   : > { %p1591_p13 = pnand %p1590_p2, %p1584_p7 }
  0x87   : > { %1594 = shalt.err (!%p1591_p13)
}
  0x88   : > { %1398 = dma.hbm_to_vmem [thread:$0]  (!%p1893_p11), %s1889_s16, 4096, %s1891_s6, %s1897_s17, %s1674_s23, %s1674_s23, %s1675_s27  }
  0x89   : > { %p2155_p9 = scmp.ne.s32.totalorder %s2149_s26, 0 }
  0x8a   : > { %s1931_s30 = sand.u32 (!%p2155_p9), 1, %s1661_s19   ;;  %p2156_p0 = scmp.ne.s32.totalorder (!%p2155_p9), %s2147_s24, 0 }
  0x8b   : > { %248 = sbr.rel (%p2155_p9) target bundleno = 697 (0x2b9), region = 40  ;;  %s1027_s7 = sshll.u32 (!%p2155_p9), %s1931_s30, 8 }
  0x8c   : > { %s251_s13 = scalar_lea.sflag (!%p2155_p9), [#allocation3], %s1931_s30  ;;  %s1937_s28 = scalar_lea.vmem (!%p2155_p9), [#allocation2], %s1027_s7 }
  0x92   : > { %1640 = dma.done.wait (%p2156_p0), %s251_s13, 4096  }
  0x93   : > { %1642 = vsyncadd (%p2156_p0), %s251_s13, 4294963200  ;;  %p2157_p11 = scmp.eq.s32.totalorder %s1732_s22, 0 }
  0x95   : > { %1644 = dma.done.wait (%p2157_p11), [#allocation6], 2064   ;;  %p2158_p6 = pmov %p2157_p11 }
  0x97   : > { %1646 = vsyncadd (%p2158_p6), [#allocation6], 4294965232  ;;  %p2159_p4 = pmov %p2158_p6 }
  0x99   : > { %1648 = dma.done.wait (%p2159_p4), [#allocation9], 2064   ;;  %p2160_p8 = pmov %p2159_p4 }
  0x9a   : > { %v331_v0 = vld [vmem:[#allocation5] sm:$0xff]  ;;  %v332_v1 = vld [vmem:[#allocation5 + $0x8] sm:$0xff]  ;;  %v333_v2 = vld [vmem:[#allocation5 + $0x10] sm:$0xff]  ;;  %s2023_s24 = scalar_lea.vmem [#allocation11], %s1027_s7  ;;  %s1041_s26 = sshll.u32 %s1732_s22, 12 }
  0x9b   : > { %1650 = vsyncadd (%p2160_p8), [#allocation9], 4294965232  ;;  %v1298_v3 = vpack.c.bf16 %v332_v1, %v331_v0  ;;  %v334_v4 = vld [vmem:[#allocation5 + $0x18] sm:$0xff]  ;;  %v335_v6 = vld [vmem:[#allocation5 + $0x20] sm:$0xff]  ;;  %s905_s23 = sshll.u32 %s2023_s24, 4  ;;  %s2089_s6 = scalar_lea.hbm %s2143_s5, %s1041_s26  ;;  %s2091_s23 = int_to_ptr.vmem [resolvable:$true] %s905_s23 }
  0x9c   : > { %v1302_v5 = vpack.c.bf16 %v334_v4, %v333_v2  ;;  %v336_v7 = vld [vmem:[#allocation5 + $0x28] sm:$0xff]  ;;  %v299_v9 = vld [vmem:[%s1937_s28] sm:$0xff]  ;;  %v337_v10 = vld [vmem:[#allocation5 + $0x30] sm:$0xff]  ;;  %s892_s22 = scalar_lea.sflag [#allocation4], %s1931_s30  ;;  %s1595_s17 = scalar_lea.vmem %s2091_s23, 4096 }
  0x9d   : > { %1299 = vmatprep.subr.bf16.mxu0 %v1298_v3  ;;  %v1306_v8 = vpack.c.bf16 %v336_v7, %v335_v6  ;;  %v338_v11 = vld [vmem:[#allocation5 + $0x38] sm:$0xff]  ;;  %1170 = vmatprep.mubr.f32.mxu0 %v299_v9  ;;  %v339_v13 = vld [vmem:[#allocation5 + $0x40] sm:$0xff]  ;;  %v340_v14 = vld [vmem:[#allocation5 + $0x48] sm:$0xff]  ;;  %p1596_p3 = scmp.ne.s32.totalorder %s2091_s23, %s1595_s17  ;;  %s1678_s15 = smov [#allocation11]  }
  0x9e   : > { %1301 = vmatpush3.bf16.msra.mxu0 %v1298_v3  ;;  %v1310_v12 = vpack.c.bf16 %v338_v11, %v337_v10  ;;  %v1314_v15 = vpack.c.bf16 %v340_v14, %v339_v13  ;;  %v341_v16 = vld [vmem:[#allocation5 + $0x50] sm:$0xff]  ;;  %v342_v17 = vld [vmem:[#allocation5 + $0x58] sm:$0xff]  ;;  %v611_v18 = vld [vmem:[#allocation8] sm:$0xff]  ;;  %s1599_s11 = sshll.u32 %s1678_s15, 4  ;;  %s1600_s11 = int_to_ptr.vmem [resolvable:$false] %s1599_s11 }
  0x9f   : > { %1303 = vmatprep.subr.bf16.mxu0 %v1302_v5  ;;  %v612_v19 = vld [vmem:[#allocation8 + $0x8] sm:$0xff]  ;;  %v613_v20 = vld [vmem:[#allocation8 + $0x10] sm:$0xff]  ;;  %v1318_v21 = vpack.c.bf16 %v342_v17, %v341_v16  ;;  %v343_v22 = vld [vmem:[#allocation5 + $0x60] sm:$0xff]  ;;  %p1597_p5 = pnand %p1596_p3, %p1876_p10  ;;  %s1601_s8 = scalar_lea.vmem %s1600_s11, 8192 }
  0xa0   : > { %v1330_v23 = vpack.c.bf16 %v612_v19, %v611_v18  ;;  %v614_v24 = vld [vmem:[#allocation8 + $0x18] sm:$0xff]  ;;  %v344_v25 = vld [vmem:[#allocation5 + $0x68] sm:$0xff]  ;;  %v345_v30 = vld [vmem:[#allocation5 + $0x70] sm:$0xff]  ;;  %p1602_p12 = scmp.lt.s32.totalorder %s2091_s23, %s1600_s11  ;;  %p1603_p1 = scmp.lt.s32.totalorder %s1601_s8, %s1595_s17 }
  0xa1   : > { %v1334_v26 = vpack.c.bf16 %v614_v24, %v613_v20  ;;  %v615_v27 = vld [vmem:[#allocation8 + $0x20] sm:$0xff]  ;;  %v616_v28 = vld [vmem:[#allocation8 + $0x28] sm:$0xff]  ;;  %v1322_v29 = vpack.c.bf16 %v344_v25, %v343_v22  ;;  %v346_v32 = vld [vmem:[#allocation5 + $0x78] sm:$0xff]  ;;  %p1598_p7 = pneg %p1597_p5 }
  0xa2   : > { %1305 = vmatpush3.bf16.msra.mxu0 %v1302_v5  ;;  %1331 = vmatprep.subr.bf16.mxu1 %v1330_v23  ;;  %v1338_v31 = vpack.c.bf16 %v616_v28, %v615_v27  ;;  %v617_v33 = vld [vmem:[#allocation8 + $0x30] sm:$0xff]  ;;  %v618_v34 = vld [vmem:[#allocation8 + $0x38] sm:$0xff]  ;;  %v1326_v35 = vpack.c.bf16 %v346_v32, %v345_v30  ;;  %v619_v37 = vld [vmem:[#allocation8 + $0x40] sm:$0xff]  ;;  %p1604_p2 = por %p1603_p1, %p1602_p12 }
  0xa3   : > { %1307 = vmatprep.subr.bf16.mxu0 %v1306_v8  ;;  %1333 = vmatpush3.bf16.msra.mxu1 %v1330_v23  ;;  %v1342_v36 = vpack.c.bf16 %v618_v34, %v617_v33  ;;  %v620_v38 = vld [vmem:[#allocation8 + $0x48] sm:$0xff]  ;;  %v621_v40 = vld [vmem:[#allocation8 + $0x50] sm:$0xff]  ;;  %v622_v41 = vld [vmem:[#allocation8 + $0x58] sm:$0xff] }
  0xa4   : > { %1335 = vmatprep.subr.bf16.mxu1 %v1334_v26  ;;  %v1346_v39 = vpack.c.bf16 %v620_v38, %v619_v37  ;;  %v300_v42 = vld [vmem:[%s1937_s28 + $0x8] sm:$0xff]  ;;  %v301_v43 = vld [vmem:[%s1937_s28 + $0x10] sm:$0xff]  ;;  %v1350_v44 = vpack.c.bf16 %v622_v41, %v621_v40  ;;  %v302_v47 = vld [vmem:[%s1937_s28 + $0x18] sm:$0xff]  ;;  %p1605_p13 = pnand %p1604_p2, %p1598_p7 }
  0xa5   : > { %v623_v45 = vld [vmem:[#allocation8 + $0x60] sm:$0xff]  ;;  %v624_v46 = vld [vmem:[#allocation8 + $0x68] sm:$0xff]  ;;  %v306_v52 = vld [vmem:[%s1937_s28 + $0x38] sm:$0xff] }
  0xa6   : > { %1309 = vmatpush3.bf16.msra.mxu0 %v1306_v8  ;;  %v303_v48 = vld [vmem:[%s1937_s28 + $0x20] sm:$0xff]  ;;  %v1354_v49 = vpack.c.bf16 %v624_v46, %v623_v45  ;;  %v304_v50 = vld [vmem:[%s1937_s28 + $0x28] sm:$0xff]  ;;  %v305_v51 = vld [vmem:[%s1937_s28 + $0x30] sm:$0xff] }
  0xa7   : > { %1311 = vmatprep.subr.bf16.mxu0 %v1310_v12  ;;  %1337 = vmatpush3.bf16.msra.mxu1 %v1334_v26  ;;  %v307_v53 = vld [vmem:[%s1937_s28 + $0x40] sm:$0xff]  ;;  %v308_v54 = vld [vmem:[%s1937_s28 + $0x48] sm:$0xff]  ;;  %v309_v55 = vld [vmem:[%s1937_s28 + $0x50] sm:$0xff] }
  0xa8   : > { %1339 = vmatprep.subr.bf16.mxu1 %v1338_v31  ;;  %v310_v56 = vld [vmem:[%s1937_s28 + $0x58] sm:$0xff]  ;;  %v311_v57 = vld [vmem:[%s1937_s28 + $0x60] sm:$0xff]  ;;  %v312_v58 = vld [vmem:[%s1937_s28 + $0x68] sm:$0xff] }
  0xa9   : > { %v313_v59 = vld [vmem:[%s1937_s28 + $0x70] sm:$0xff]  ;;  %v314_v60 = vld [vmem:[%s1937_s28 + $0x78] sm:$0xff]  ;;  %v315_v61 = vld [vmem:[%s1937_s28 + $0x80] sm:$0xff] }
  0xaa   : > { %1313 = vmatpush3.bf16.msra.mxu0 %v1310_v12  ;;  %v316_v62 = vld [vmem:[%s1937_s28 + $0x88] sm:$0xff]  ;;  %v317_v63 = vld [vmem:[%s1937_s28 + $0x90] sm:$0xff]  ;;  %v318_v0 = vld [vmem:[%s1937_s28 + $0x98] sm:$0xff] }
  0xab   : > { %1315 = vmatprep.subr.bf16.mxu0 %v1314_v15  ;;  %1341 = vmatpush3.bf16.msra.mxu1 %v1338_v31  ;;  %v319_v1 = vld [vmem:[%s1937_s28 + $0xa0] sm:$0xff]  ;;  %v320_v2 = vld [vmem:[%s1937_s28 + $0xa8] sm:$0xff]  ;;  %v321_v3 = vld [vmem:[%s1937_s28 + $0xb0] sm:$0xff] }
  0xac   : > { %1343 = vmatprep.subr.bf16.mxu1 %v1342_v36  ;;  %v322_v4 = vld [vmem:[%s1937_s28 + $0xb8] sm:$0xff]  ;;  %v323_v5 = vld [vmem:[%s1937_s28 + $0xc0] sm:$0xff]  ;;  %v324_v6 = vld [vmem:[%s1937_s28 + $0xc8] sm:$0xff] }
  0xad   : > { %v325_v7 = vld [vmem:[%s1937_s28 + $0xd0] sm:$0xff]  ;;  %v326_v8 = vld [vmem:[%s1937_s28 + $0xd8] sm:$0xff]  ;;  %v327_v9 = vld [vmem:[%s1937_s28 + $0xe0] sm:$0xff] }
  0xae   : > { %1317 = vmatpush3.bf16.msra.mxu0 %v1314_v15  ;;  %v328_v10 = vld [vmem:[%s1937_s28 + $0xe8] sm:$0xff]  ;;  %v329_v11 = vld [vmem:[%s1937_s28 + $0xf0] sm:$0xff]  ;;  %v330_v12 = vld [vmem:[%s1937_s28 + $0xf8] sm:$0xff] }
  0xaf   : > { %1319 = vmatprep.subr.bf16.mxu0 %v1318_v21  ;;  %1345 = vmatpush3.bf16.msra.mxu1 %v1342_v36  ;;  %v625_v13 = vld [vmem:[#allocation8 + $0x70] sm:$0xff]  ;;  %v626_v14 = vld [vmem:[#allocation8 + $0x78] sm:$0xff] }
  0xb0   : > { %1347 = vmatprep.subr.bf16.mxu1 %v1346_v39  ;;  %v1358_v15 = vpack.c.bf16 %v626_v14, %v625_v13  ;;  %v1983_v16 = vld [vmem:[#allocation7] ss:$0 sm:$0xff] }
  0xb2   : > { %1321 = vmatpush3.bf16.msra.mxu0 %v1318_v21 }
  0xb3   : > { %1323 = vmatprep.subr.bf16.mxu0 %v1322_v29  ;;  %1349 = vmatpush3.bf16.msra.mxu1 %v1346_v39 }
  0xb4   : > { %1351 = vmatprep.subr.bf16.mxu1 %v1350_v44 }
  0xb6   : > { %1325 = vmatpush3.bf16.msra.mxu0 %v1322_v29 }
  0xb7   : > { %1327 = vmatprep.subr.bf16.mxu0 %v1326_v35  ;;  %1353 = vmatpush3.bf16.msra.mxu1 %v1350_v44 }
  0xb8   : > { %1355 = vmatprep.subr.bf16.mxu1 %v1354_v49 }
  0xba   : > { %1329 = vmatpush3.bf16.msra.mxu0 %v1326_v35 }
  0xbb   : > { %1357 = vmatpush3.bf16.msra.mxu1 %v1354_v49 }
  0xbc   : > { %1359 = vmatprep.subr.bf16.mxu1 %v1358_v15 }
  0xbd   : > { %1171 = vmatmul.mubr.f32.vlgmr.msra.gmra.mrb[0].mxu0 %v300_v42 }
  0xbe   : > { %1173 = vmatprep.mubr.f32.mxu0 %v301_v43 }
  0xbf   : > { %1361 = vmatpush3.bf16.msra.mxu1 %v1358_v15 }
  0xc1   : > { %1174 = vmatmul.mubr.f32.gmra.mrb[2].mxu0 %v302_v47 }
  0xc2   : > { %1176 = vmatprep.mubr.f32.mxu0 %v303_v48 }
  0xc5   : > { %1177 = vmatmul.mubr.f32.gmra.mrb[4].mxu0 %v304_v50 }
  0xc6   : > { %1179 = vmatprep.mubr.f32.mxu0 %v305_v51 }
  0xc9   : > { %1180 = vmatmul.mubr.f32.gmra.mrb[6].mxu0 %v306_v52 }
  0xca   : > { %1182 = vmatprep.mubr.f32.mxu0 %v307_v53 }
  0xcd   : > { %1183 = vmatmul.mubr.f32.gmra.mrb[8].mxu0 %v308_v54 }
  0xce   : > { %1185 = vmatprep.mubr.f32.mxu0 %v309_v55 }
  0xd1   : > { %1186 = vmatmul.mubr.f32.gmra.mrb[10].mxu0 %v310_v56 }
  0xd2   : > { %1188 = vmatprep.mubr.f32.mxu0 %v311_v57 }
  0xd5   : > { %1189 = vmatmul.mubr.f32.gmra.mrb[12].mxu0 %v312_v58 }
  0xd6   : > { %1191 = vmatprep.mubr.f32.mxu0 %v313_v59 }
  0xd9   : > { %1192 = vmatmul.mubr.f32.gmra.mrb[14].mxu0 %v314_v60 }
  0xda   : > { %1194 = vmatprep.mubr.f32.mxu0 %v315_v61 }
  0xdd   : > { %1195 = vmatmul.mubr.f32.gmra.mrb[16].mxu0 %v316_v62 }
  0xde   : > { %1197 = vmatprep.mubr.f32.mxu0 %v317_v63 }
  0xe1   : > { %1198 = vmatmul.mubr.f32.gmra.mrb[18].mxu0 %v318_v0 }
  0xe2   : > { %1200 = vmatprep.mubr.f32.mxu0 %v319_v1 }
  0xe5   : > { %1201 = vmatmul.mubr.f32.gmra.mrb[20].mxu0 %v320_v2 }
  0xe6   : > { %1203 = vmatprep.mubr.f32.mxu0 %v321_v3 }
  0xe9   : > { %1204 = vmatmul.mubr.f32.gmra.mrb[22].mxu0 %v322_v4 }
  0xea   : > { %1206 = vmatprep.mubr.f32.mxu0 %v323_v5 }
  0xed   : > { %1207 = vmatmul.mubr.f32.gmra.mrb[24].mxu0 %v324_v6 }
  0xee   : > { %1209 = vmatprep.mubr.f32.mxu0 %v325_v7 }
  0xf1   : > { %1210 = vmatmul.mubr.f32.gmra.mrb[26].mxu0 %v326_v8 }
  0xf2   : > { %1212 = vmatprep.mubr.f32.mxu0 %v327_v9 }
  0xf5   : > { %1213 = vmatmul.mubr.f32.gmra.mrb[28].mxu0 %v328_v10 }
  0xf6   : > { %1215 = vmatprep.mubr.f32.mxu0 %v329_v11 }
  0xf9   : > { %1216 = vmatmul.mubr.f32.gmra.mrb[30].mxu0 %v330_v12 }
 0x190   : > { %v1172_v17 = vpop.f32.mrb[0].mxu0 }
 0x191   : > { %v426_v18 = vadd.f32 %v1172_v17, %v1983_v16  ;;  %v420_v19 = vpop.f32.mrb[1].mxu0 }
 0x192   : > { %v421_v20 = vadd.f32 %v1983_v16, %v420_v19 }
 0x193   : > { %v580_v23 = vmax.f32 %v426_v18, 0.0 }
 0x194   : > { %v1175_v21 = vpop.f32.mrb[2].mxu0  ;;  %v579_v22 = vmax.f32 %v421_v20, 0.0 }
 0x195   : > { %v436_v24 = vadd.f32 %v1175_v21, %v1983_v16  ;;  %v430_v25 = vpop.f32.mrb[3].mxu0 }
 0x196   : > { %v431_v26 = vadd.f32 %v1983_v16, %v430_v25  ;;  %1250 = vmatprep.mubr.f32.mxu1 %v579_v22 }
 0x197   : > { %1251 = vmatmul.mubr.f32.vlgmr.msra.gmra.mrb[0].mxu1 %v580_v23  ;;  %v582_v29 = vmax.f32 %v436_v24, 0.0 }
 0x198   : > { %v581_v27 = vmax.f32 %v431_v26, 0.0  ;;  %v1178_v28 = vpop.f32.mrb[4].mxu0 }
 0x199   : > { %v446_v30 = vadd.f32 %v1178_v28, %v1983_v16  ;;  %v440_v31 = vpop.f32.mrb[5].mxu0 }
 0x19a   : > { %v441_v32 = vadd.f32 %v1983_v16, %v440_v31  ;;  %1253 = vmatprep.mubr.f32.mxu1 %v581_v27 }
 0x19b   : > { %1254 = vmatmul.mubr.f32.gmra.mrb[2].mxu1 %v582_v29  ;;  %v584_v35 = vmax.f32 %v446_v30, 0.0 }
 0x19c   : > { %v583_v33 = vmax.f32 %v441_v32, 0.0  ;;  %v1181_v34 = vpop.f32.mrb[6].mxu0 }
 0x19d   : > { %v456_v36 = vadd.f32 %v1181_v34, %v1983_v16  ;;  %v450_v37 = vpop.f32.mrb[7].mxu0 }
 0x19e   : > { %v451_v38 = vadd.f32 %v1983_v16, %v450_v37  ;;  %1256 = vmatprep.mubr.f32.mxu1 %v583_v33 }
 0x19f   : > { %1257 = vmatmul.mubr.f32.gmra.mrb[4].mxu1 %v584_v35  ;;  %v586_v41 = vmax.f32 %v456_v36, 0.0 }
 0x1a0   : > { %v585_v39 = vmax.f32 %v451_v38, 0.0  ;;  %v1184_v40 = vpop.f32.mrb[8].mxu0 }
 0x1a1   : > { %v466_v42 = vadd.f32 %v1184_v40, %v1983_v16  ;;  %v460_v43 = vpop.f32.mrb[9].mxu0 }
 0x1a2   : > { %v461_v44 = vadd.f32 %v1983_v16, %v460_v43  ;;  %1259 = vmatprep.mubr.f32.mxu1 %v585_v39 }
 0x1a3   : > { %1260 = vmatmul.mubr.f32.gmra.mrb[6].mxu1 %v586_v41  ;;  %v588_v47 = vmax.f32 %v466_v42, 0.0 }
 0x1a4   : > { %v587_v45 = vmax.f32 %v461_v44, 0.0  ;;  %v1187_v46 = vpop.f32.mrb[10].mxu0 }
 0x1a5   : > { %v476_v48 = vadd.f32 %v1187_v46, %v1983_v16  ;;  %v470_v49 = vpop.f32.mrb[11].mxu0 }
 0x1a6   : > { %v471_v50 = vadd.f32 %v1983_v16, %v470_v49  ;;  %1262 = vmatprep.mubr.f32.mxu1 %v587_v45 }
 0x1a7   : > { %1263 = vmatmul.mubr.f32.gmra.mrb[8].mxu1 %v588_v47  ;;  %v590_v53 = vmax.f32 %v476_v48, 0.0 }
 0x1a8   : > { %v589_v51 = vmax.f32 %v471_v50, 0.0  ;;  %v1190_v52 = vpop.f32.mrb[12].mxu0  ;;  %v2017_v50 = vld [vmem:[#allocation10] ss:$0 sm:$0xff] }
 0x1a9   : > { %v486_v54 = vadd.f32 %v1190_v52, %v1983_v16  ;;  %v480_v55 = vpop.f32.mrb[13].mxu0 }
 0x1aa   : > { %v481_v56 = vadd.f32 %v1983_v16, %v480_v55  ;;  %1265 = vmatprep.mubr.f32.mxu1 %v589_v51 }
 0x1ab   : > { %1266 = vmatmul.mubr.f32.gmra.mrb[10].mxu1 %v590_v53  ;;  %v592_v59 = vmax.f32 %v486_v54, 0.0 }
 0x1ac   : > { %v591_v57 = vmax.f32 %v481_v56, 0.0  ;;  %v1193_v58 = vpop.f32.mrb[14].mxu0 }
 0x1ad   : > { %v496_v60 = vadd.f32 %v1193_v58, %v1983_v16  ;;  %v490_v61 = vpop.f32.mrb[15].mxu0 }
 0x1ae   : > { %v491_v62 = vadd.f32 %v1983_v16, %v490_v61  ;;  %1268 = vmatprep.mubr.f32.mxu1 %v591_v57 }
 0x1af   : > { %1269 = vmatmul.mubr.f32.gmra.mrb[12].mxu1 %v592_v59  ;;  %v594_v1 = vmax.f32 %v496_v60, 0.0 }
 0x1b0   : > { %v593_v63 = vmax.f32 %v491_v62, 0.0  ;;  %v1196_v0 = vpop.f32.mrb[16].mxu0 }
 0x1b1   : > { %v506_v2 = vadd.f32 %v1196_v0, %v1983_v16  ;;  %v500_v3 = vpop.f32.mrb[17].mxu0 }
 0x1b2   : > { %v501_v4 = vadd.f32 %v1983_v16, %v500_v3  ;;  %1271 = vmatprep.mubr.f32.mxu1 %v593_v63 }
 0x1b3   : > { %1272 = vmatmul.mubr.f32.gmra.mrb[14].mxu1 %v594_v1  ;;  %v596_v7 = vmax.f32 %v506_v2, 0.0 }
 0x1b4   : > { %v595_v5 = vmax.f32 %v501_v4, 0.0  ;;  %v1199_v6 = vpop.f32.mrb[18].mxu0 }
 0x1b5   : > { %v516_v8 = vadd.f32 %v1199_v6, %v1983_v16  ;;  %v510_v9 = vpop.f32.mrb[19].mxu0 }
 0x1b6   : > { %v511_v10 = vadd.f32 %v1983_v16, %v510_v9  ;;  %1274 = vmatprep.mubr.f32.mxu1 %v595_v5 }
 0x1b7   : > { %1275 = vmatmul.mubr.f32.gmra.mrb[16].mxu1 %v596_v7  ;;  %v598_v13 = vmax.f32 %v516_v8, 0.0 }
 0x1b8   : > { %v597_v11 = vmax.f32 %v511_v10, 0.0  ;;  %v1202_v12 = vpop.f32.mrb[20].mxu0 }
 0x1b9   : > { %v526_v14 = vadd.f32 %v1202_v12, %v1983_v16  ;;  %v520_v15 = vpop.f32.mrb[21].mxu0 }
 0x1ba   : > { %v521_v17 = vadd.f32 %v1983_v16, %v520_v15  ;;  %1277 = vmatprep.mubr.f32.mxu1 %v597_v11 }
 0x1bb   : > { %1278 = vmatmul.mubr.f32.gmra.mrb[18].mxu1 %v598_v13  ;;  %v600_v20 = vmax.f32 %v526_v14, 0.0 }
 0x1bc   : > { %v599_v18 = vmax.f32 %v521_v17, 0.0  ;;  %v1205_v19 = vpop.f32.mrb[22].mxu0 }
 0x1bd   : > { %v536_v21 = vadd.f32 %v1205_v19, %v1983_v16  ;;  %v530_v22 = vpop.f32.mrb[23].mxu0 }
 0x1be   : > { %v531_v23 = vadd.f32 %v1983_v16, %v530_v22  ;;  %1280 = vmatprep.mubr.f32.mxu1 %v599_v18 }
 0x1bf   : > { %1281 = vmatmul.mubr.f32.gmra.mrb[20].mxu1 %v600_v20  ;;  %v602_v26 = vmax.f32 %v536_v21, 0.0 }
 0x1c0   : > { %v601_v24 = vmax.f32 %v531_v23, 0.0  ;;  %v1208_v25 = vpop.f32.mrb[24].mxu0 }
 0x1c1   : > { %v546_v27 = vadd.f32 %v1208_v25, %v1983_v16  ;;  %v540_v28 = vpop.f32.mrb[25].mxu0 }
 0x1c2   : > { %v541_v29 = vadd.f32 %v1983_v16, %v540_v28  ;;  %1283 = vmatprep.mubr.f32.mxu1 %v601_v24 }
 0x1c3   : > { %1284 = vmatmul.mubr.f32.gmra.mrb[22].mxu1 %v602_v26  ;;  %v604_v32 = vmax.f32 %v546_v27, 0.0 }
 0x1c4   : > { %v603_v30 = vmax.f32 %v541_v29, 0.0  ;;  %v1211_v31 = vpop.f32.mrb[26].mxu0 }
 0x1c5   : > { %v556_v33 = vadd.f32 %v1211_v31, %v1983_v16  ;;  %v550_v34 = vpop.f32.mrb[27].mxu0 }
 0x1c6   : > { %v551_v35 = vadd.f32 %v1983_v16, %v550_v34  ;;  %1286 = vmatprep.mubr.f32.mxu1 %v603_v30 }
 0x1c7   : > { %1287 = vmatmul.mubr.f32.gmra.mrb[24].mxu1 %v604_v32  ;;  %v606_v38 = vmax.f32 %v556_v33, 0.0 }
 0x1c8   : > { %v605_v36 = vmax.f32 %v551_v35, 0.0  ;;  %v1214_v37 = vpop.f32.mrb[28].mxu0 }
 0x1c9   : > { %v566_v39 = vadd.f32 %v1214_v37, %v1983_v16  ;;  %v560_v40 = vpop.f32.mrb[29].mxu0 }
 0x1ca   : > { %v561_v41 = vadd.f32 %v1983_v16, %v560_v40  ;;  %1289 = vmatprep.mubr.f32.mxu1 %v605_v36 }
 0x1cb   : > { %1290 = vmatmul.mubr.f32.gmra.mrb[26].mxu1 %v606_v38  ;;  %v608_v44 = vmax.f32 %v566_v39, 0.0 }
 0x1cc   : > { %v607_v42 = vmax.f32 %v561_v41, 0.0  ;;  %v1217_v43 = vpop.f32.mrb[30].mxu0 }
 0x1cd   : > { %v576_v45 = vadd.f32 %v1217_v43, %v1983_v16  ;;  %v570_v46 = vpop.f32.mrb[31].mxu0 }
 0x1ce   : > { %v571_v47 = vadd.f32 %v1983_v16, %v570_v46  ;;  %1292 = vmatprep.mubr.f32.mxu1 %v607_v42 }
 0x1cf   : > { %1293 = vmatmul.mubr.f32.gmra.mrb[28].mxu1 %v608_v44  ;;  %v610_v49 = vmax.f32 %v576_v45, 0.0 }
 0x1d0   : > { %v609_v48 = vmax.f32 %v571_v47, 0.0 }
 0x1d2   : > { %1295 = vmatprep.mubr.f32.mxu1 %v609_v48 }
 0x1d3   : > { %1296 = vmatmul.mubr.f32.gmra.mrb[30].mxu1 %v610_v49 }
 0x26a   : > { %v1252_v51 = vpop.f32.mrb[0].mxu1 }
 0x26b   : > { %v706_v52 = vadd.f32 %v1252_v51, %v2017_v50  ;;  %v700_v53 = vpop.f32.mrb[1].mxu1 }
 0x26c   : > { %v701_v54 = vadd.f32 %v2017_v50, %v700_v53 }
 0x26d   : > { %860 = vst [vmem:[%s2023_s24 + $0x8] sm:$0xff] %v706_v52 }
 0x26e   : > { %859 = vst [vmem:[%s2023_s24] sm:$0xff] %v701_v54  ;;  %v1255_v16 = vpop.f32.mrb[2].mxu1 }
 0x26f   : > { %v716_v55 = vadd.f32 %v1255_v16, %v2017_v50  ;;  %v710_v56 = vpop.f32.mrb[3].mxu1 }
 0x270   : > { %v711_v57 = vadd.f32 %v2017_v50, %v710_v56 }
 0x271   : > { %862 = vst [vmem:[%s2023_s24 + $0x18] sm:$0xff] %v716_v55 }
 0x272   : > { %861 = vst [vmem:[%s2023_s24 + $0x10] sm:$0xff] %v711_v57  ;;  %v1258_v58 = vpop.f32.mrb[4].mxu1 }
 0x273   : > { %v726_v59 = vadd.f32 %v1258_v58, %v2017_v50  ;;  %v720_v60 = vpop.f32.mrb[5].mxu1 }
 0x274   : > { %v721_v61 = vadd.f32 %v2017_v50, %v720_v60 }
 0x275   : > { %864 = vst [vmem:[%s2023_s24 + $0x28] sm:$0xff] %v726_v59 }
 0x276   : > { %863 = vst [vmem:[%s2023_s24 + $0x20] sm:$0xff] %v721_v61  ;;  %v1261_v62 = vpop.f32.mrb[6].mxu1 }
 0x277   : > { %v736_v63 = vadd.f32 %v1261_v62, %v2017_v50  ;;  %v730_v0 = vpop.f32.mrb[7].mxu1 }
 0x278   : > { %v731_v1 = vadd.f32 %v2017_v50, %v730_v0 }
 0x279   : > { %866 = vst [vmem:[%s2023_s24 + $0x38] sm:$0xff] %v736_v63 }
 0x27a   : > { %865 = vst [vmem:[%s2023_s24 + $0x30] sm:$0xff] %v731_v1  ;;  %v1264_v2 = vpop.f32.mrb[8].mxu1 }
 0x27b   : > { %v746_v3 = vadd.f32 %v1264_v2, %v2017_v50  ;;  %v740_v4 = vpop.f32.mrb[9].mxu1 }
 0x27c   : > { %v741_v5 = vadd.f32 %v2017_v50, %v740_v4 }
 0x27d   : > { %868 = vst [vmem:[%s2023_s24 + $0x48] sm:$0xff] %v746_v3 }
 0x27e   : > { %867 = vst [vmem:[%s2023_s24 + $0x40] sm:$0xff] %v741_v5  ;;  %v1267_v6 = vpop.f32.mrb[10].mxu1 }
 0x27f   : > { %v756_v7 = vadd.f32 %v1267_v6, %v2017_v50  ;;  %v750_v8 = vpop.f32.mrb[11].mxu1 }
 0x280   : > { %v751_v9 = vadd.f32 %v2017_v50, %v750_v8 }
 0x281   : > { %870 = vst [vmem:[%s2023_s24 + $0x58] sm:$0xff] %v756_v7 }
 0x282   : > { %869 = vst [vmem:[%s2023_s24 + $0x50] sm:$0xff] %v751_v9  ;;  %v1270_v10 = vpop.f32.mrb[12].mxu1 }
 0x283   : > { %v766_v11 = vadd.f32 %v1270_v10, %v2017_v50  ;;  %v760_v12 = vpop.f32.mrb[13].mxu1 }
 0x284   : > { %v761_v13 = vadd.f32 %v2017_v50, %v760_v12 }
 0x285   : > { %872 = vst [vmem:[%s2023_s24 + $0x68] sm:$0xff] %v766_v11 }
 0x286   : > { %871 = vst [vmem:[%s2023_s24 + $0x60] sm:$0xff] %v761_v13  ;;  %v1273_v14 = vpop.f32.mrb[14].mxu1 }
 0x287   : > { %v776_v15 = vadd.f32 %v1273_v14, %v2017_v50  ;;  %v770_v17 = vpop.f32.mrb[15].mxu1 }
 0x288   : > { %v771_v18 = vadd.f32 %v2017_v50, %v770_v17 }
 0x289   : > { %874 = vst [vmem:[%s2023_s24 + $0x78] sm:$0xff] %v776_v15 }
 0x28a   : > { %873 = vst [vmem:[%s2023_s24 + $0x70] sm:$0xff] %v771_v18  ;;  %v1276_v19 = vpop.f32.mrb[16].mxu1 }
 0x28b   : > { %v786_v20 = vadd.f32 %v1276_v19, %v2017_v50  ;;  %v780_v21 = vpop.f32.mrb[17].mxu1 }
 0x28c   : > { %v781_v22 = vadd.f32 %v2017_v50, %v780_v21 }
 0x28d   : > { %876 = vst [vmem:[%s2023_s24 + $0x88] sm:$0xff] %v786_v20 }
 0x28e   : > { %875 = vst [vmem:[%s2023_s24 + $0x80] sm:$0xff] %v781_v22  ;;  %v1279_v23 = vpop.f32.mrb[18].mxu1 }
 0x28f   : > { %v796_v24 = vadd.f32 %v1279_v23, %v2017_v50  ;;  %v790_v25 = vpop.f32.mrb[19].mxu1 }
 0x290   : > { %v791_v26 = vadd.f32 %v2017_v50, %v790_v25 }
 0x291   : > { %878 = vst [vmem:[%s2023_s24 + $0x98] sm:$0xff] %v796_v24 }
 0x292   : > { %877 = vst [vmem:[%s2023_s24 + $0x90] sm:$0xff] %v791_v26  ;;  %v1282_v27 = vpop.f32.mrb[20].mxu1 }
 0x293   : > { %v806_v28 = vadd.f32 %v1282_v27, %v2017_v50  ;;  %v800_v29 = vpop.f32.mrb[21].mxu1 }
 0x294   : > { %v801_v30 = vadd.f32 %v2017_v50, %v800_v29 }
 0x295   : > { %880 = vst [vmem:[%s2023_s24 + $0xa8] sm:$0xff] %v806_v28 }
 0x296   : > { %879 = vst [vmem:[%s2023_s24 + $0xa0] sm:$0xff] %v801_v30  ;;  %v1285_v31 = vpop.f32.mrb[22].mxu1 }
 0x297   : > { %v816_v32 = vadd.f32 %v1285_v31, %v2017_v50  ;;  %v810_v33 = vpop.f32.mrb[23].mxu1 }
 0x298   : > { %v811_v34 = vadd.f32 %v2017_v50, %v810_v33 }
 0x299   : > { %882 = vst [vmem:[%s2023_s24 + $0xb8] sm:$0xff] %v816_v32 }
 0x29a   : > { %881 = vst [vmem:[%s2023_s24 + $0xb0] sm:$0xff] %v811_v34  ;;  %v1288_v35 = vpop.f32.mrb[24].mxu1 }
 0x29b   : > { %v826_v36 = vadd.f32 %v1288_v35, %v2017_v50  ;;  %v820_v37 = vpop.f32.mrb[25].mxu1 }
 0x29c   : > { %v821_v38 = vadd.f32 %v2017_v50, %v820_v37 }
 0x29d   : > { %884 = vst [vmem:[%s2023_s24 + $0xc8] sm:$0xff] %v826_v36 }
 0x29e   : > { %883 = vst [vmem:[%s2023_s24 + $0xc0] sm:$0xff] %v821_v38  ;;  %v1291_v39 = vpop.f32.mrb[26].mxu1 }
 0x29f   : > { %v836_v40 = vadd.f32 %v1291_v39, %v2017_v50  ;;  %v830_v41 = vpop.f32.mrb[27].mxu1 }
 0x2a0   : > { %v831_v42 = vadd.f32 %v2017_v50, %v830_v41 }
 0x2a1   : > { %886 = vst [vmem:[%s2023_s24 + $0xd8] sm:$0xff] %v836_v40 }
 0x2a2   : > { %885 = vst [vmem:[%s2023_s24 + $0xd0] sm:$0xff] %v831_v42  ;;  %v1294_v43 = vpop.f32.mrb[28].mxu1 }
 0x2a3   : > { %v846_v44 = vadd.f32 %v1294_v43, %v2017_v50  ;;  %v840_v45 = vpop.f32.mrb[29].mxu1 }
 0x2a4   : > { %v841_v46 = vadd.f32 %v2017_v50, %v840_v45 }
 0x2a5   : > { %888 = vst [vmem:[%s2023_s24 + $0xe8] sm:$0xff] %v846_v44 }
 0x2a6   : > { %887 = vst [vmem:[%s2023_s24 + $0xe0] sm:$0xff] %v841_v46  ;;  %v1297_v47 = vpop.f32.mrb[30].mxu1 }
 0x2a7   : > { %v856_v48 = vadd.f32 %v1297_v47, %v2017_v50  ;;  %v850_v49 = vpop.f32.mrb[31].mxu1 }
 0x2a8   : > { %v851_v51 = vadd.f32 %v2017_v50, %v850_v49 }
 0x2a9   : > { %890 = vst [vmem:[%s2023_s24 + $0xf8] sm:$0xff] %v856_v48 }
 0x2aa   : > { %889 = vst [vmem:[%s2023_s24 + $0xf0] sm:$0xff] %v851_v51 }
 0x2ab   : > { %1608 = shalt.err (!%p1605_p13)
}
 0x2ac   : > { %s1609_s29 = scalar_lea.hbm %s2089_s6, 4096  ;;  %s1613_s13 = scalar_lea.hbm %s2143_s5, 8192 }
 0x2ad   : > { %p1610_p9 = scmp.ne.s32.totalorder %s2089_s6, %s1609_s29  ;;  %p1614_p6 = scmp.lt.u32.totalorder %s2089_s6, %s2143_s5 }
 0x2ae   : > { %p1615_p4 = scmp.lt.u32.totalorder %s1613_s13, %s1609_s29  ;;  %p1617_p3 = scmp.lt.u32.totalorder %s1609_s29, %s2089_s6 }
 0x2af   : > { %p1611_p0 = pnand %p1610_p9, %p1876_p10 }
 0x2b0   : > { %p1616_p8 = por %p1615_p4, %p1614_p6 }
 0x2b1   : > { %p1612_p11 = pneg %p1611_p0 }
 0x2b2   : > { %p1618_p5 = por %p1617_p3, %p1616_p8 }
 0x2b4   : > { %p1619_p7 = pnand %p1618_p5, %p1612_p11 }
 0x2b6   : > { %1622 = shalt.err (!%p1619_p7)
}
 0x2b7   : > { %s1679_s26 = smov 128   ;;  %s1680_s27 = smov 8  }
 0x2b8   : > { %1380 = dma.vmem_to_hbm [thread:$0]  (%p1876_p10), %s2091_s23, 4096, %s2089_s6, %s892_s22, %s1679_s26, %s1679_s26, %s1680_s27  }
 0x2b9 PF: > { %s920_s16 = sand.u32 1, %s1657_s18   ;;  %p2161_p12 = scmp.ne.s32.totalorder %s2148_s25, 0 }
 0x2ba   : > { %p2162_p1 = scmp.ge.s32.totalorder %s1669_s21, 2  ;;  %s921_s17 = scalar_lea.sflag [#allocation4], %s920_s16 }
 0x2bc   : > { %p1400_p2 = pnand %p2162_p1, %p2161_p12 }
 0x2be   : > { %1652 = dma.done.wait (!%p1400_p2), %s921_s17, 4096  }
 0x2bf   : > { %1654 = vsyncadd (!%p1400_p2), %s921_s17, 4294963200  ;;  %p20_p13 = scmp.ge.s32.totalorder %s1866_s14, 4   ;;  %s2163_s18 = smov %s1661_s19 }
 0x2c0   : > { %s2164_s19 = smov %s1665_s20  ;;  %s2165_s20 = smov %s1882_s10 }
 0x2c1   : > { %s2166_s21 = smov %s1866_s14  ;;  %22 = sbr.rel (!%p20_p13) target bundleno = 7 (0x7), region = 101 }
 0x2c8   :  { %926 = vsyncpa [#allocation3], 1 }
 0x2c9   :  { %928 = vsyncpa [#allocation3 + $0x1], 1 }
 0x2ca   :  { %929 = vsyncpa [#allocation6], 1 }
 0x2cb   :  { %930 = vsyncpa [#allocation9], 1 }
 0x2cc   :  { %931 = vsyncpa [#allocation4], 1 }
 0x2cd   :  { %933 = vsyncpa [#allocation4 + $0x1], 1 }

</bundles_post_ra>
